<compile_context>
chip_gen: v5e
topology: v5e:2x2
jax: 0.10.0
libtpu: 0.0.40
codegen_flags: <defaults>
</compile_context>

<pallas_src>
import functools

import jax
import jax.numpy as jnp
from jax.experimental import pallas as pl
from jax.experimental.pallas import tpu as pltpu

_LANES = 128
_MAX_BLOCK_ROWS = 8192                 # 8192 x 128 x 4B = 4 MiB per f32 tile
_VMEM_LIMIT_BYTES = 48 * 1024 * 1024   # covers 2 inputs x 2 buffers at max tile


def _round_down(x, m):
    return (x // m) * m


def _row_align(*dtypes):
    """Sublane multiple required by the narrowest input dtype (8/16/32)."""
    align = 8
    for dt in dtypes:
        item = jnp.dtype(dt).itemsize
        if item == 2:
            align = max(align, 16)
        elif item == 1:
            align = max(align, 32)
    return align


def _num_tensorcores():
    """Best-effort TensorCores-per-chip (2 on v7x, 1 on v5e/v6e). Safe fallbacks."""
    try:
        get_info = getattr(pltpu, "get_tpu_info", None)
        if get_info is not None:
            info = get_info()
            for attr in ("num_cores", "num_tensorcores", "core_count",
                         "tensorcore_count"):
                v = getattr(info, attr, None)
                if isinstance(v, int) and v >= 1:
                    return min(v, 2)
    except Exception:
        pass
    try:
        kind = jax.devices()[0].device_kind.lower()
        if "v7" in kind:
            return 2
    except Exception:
        pass
    return 1


def _loss_sum_kernel(yt_ref, yp_ref, o_ref, *, negative_slope, block_rows,
                     acc_rows, steps_per_split, bulk_rows):
    c = pl.program_id(0)   # which split (TensorCore on v7x)
    i = pl.program_id(1)   # reduction step within the split

    @pl.when(i == 0)
    def _():
        o_ref[...] = jnp.zeros_like(o_ref)

    diff = yt_ref[...].astype(jnp.float32) - yp_ref[...].astype(jnp.float32)
    # abs(leaky_relu(d, s)) == where(d >= 0, d, -s * d) for s > 0.
    val = jnp.where(diff >= 0, diff, diff * (-negative_slope))

    folds = block_rows // acc_rows
    step = c * steps_per_split + i
    row0 = step * block_rows
    # Only the trailing partial block / clamped duplicate block needs the mask.
    needs_mask = row0 + block_rows > bulk_rows

    @pl.when(jnp.logical_not(needs_mask))
    def _():
        # Fast path: pure vreg-aligned VPU adds into the resident accumulator.
        o_ref[...] += val.reshape(folds, acc_rows, _LANES).sum(axis=0)

    @pl.when(needs_mask)
    def _():
        row_ids = jax.lax.broadcasted_iota(jnp.int32, (block_rows, _LANES), 0)
        masked = jnp.where(row_ids + row0 < bulk_rows, val, 0.0)
        o_ref[...] += masked.reshape(folds, acc_rows, _LANES).sum(axis=0)


def custom_loss(y_pred, y_true, negative_slope=0.05):
    assert y_pred.shape == y_true.shape
    total_count = 1
    for d in y_pred.shape:
        total_count *= d
    neg = float(negative_slope)

    bulk_rows = total_count // _LANES
    bulk = bulk_rows * _LANES
    tail = total_count - bulk
    row_align = _row_align(y_pred.dtype, y_true.dtype)

    if bulk_rows < row_align:
        # Tiny input: plain jnp is cheaper than launching a kernel.
        d = (y_true.reshape(-1).astype(jnp.float32)
             - y_pred.reshape(-1).astype(jnp.float32))
        v = jnp.where(d >= 0, d, d * (-neg))
        return jnp.sum(v) / jnp.float32(total_count)

    tail_sum = jnp.float32(0.0)
    if tail:
        # TODO(synk): when total_count % 128 != 0 the [:bulk] slices below
        # materialize a copy of both inputs (extra HBM traffic); a zero-copy
        # version would take the flat arrays via memory_space=pl.ANY and
        # manually DMA the ragged <128-element tail.
        yp_flat = y_pred.reshape(-1)
        yt_flat = y_true.reshape(-1)
        yp2d = yp_flat[:bulk].reshape(bulk_rows, _LANES)
        yt2d = yt_flat[:bulk].reshape(bulk_rows, _LANES)
        d = (yt_flat[bulk:].astype(jnp.float32)
             - yp_flat[bulk:].astype(jnp.float32))
        tail_sum = jnp.sum(jnp.where(d >= 0, d, d * (-neg)))
    else:
        # Free reshape, no HBM copies.
        yp2d = y_pred.reshape(bulk_rows, _LANES)
        yt2d = y_true.reshape(bulk_rows, _LANES)

    # Largest legal block: rounded DOWN to the dtype sublane multiple so the
    # BlockSpec always tiles the array; trailing partial block masked in-kernel.
    block_rows = min(_MAX_BLOCK_ROWS, _round_down(bulk_rows, row_align))
    # Widest accumulator height that divides the block (more independent
    # accumulator vregs -> shorter dependent-add chains; matters on v7x).
    if block_rows % 32 == 0:
        acc_rows = 32
    elif block_rows % 16 == 0:
        acc_rows = 16
    else:
        acc_rows = 8

    total_steps = pl.cdiv(bulk_rows, block_rows)
    # Split the reduction across TensorCores only where it pays off (v7x).
    num_splits = max(1, min(_num_tensorcores(), total_steps))
    steps_per_split = pl.cdiv(total_steps, num_splits)

    def in_map(c, i):
        # Clamp so a split never indexes past the array; the in-kernel mask
        # zeroes any duplicated / out-of-range rows.
        return (jnp.minimum(c * steps_per_split + i, total_steps - 1), 0)

    kernel = functools.partial(
        _loss_sum_kernel,
        negative_slope=neg,
        block_rows=block_rows,
        acc_rows=acc_rows,
        steps_per_split=steps_per_split,
        bulk_rows=bulk_rows,
    )

    out_rows = num_splits * acc_rows
    bytes_per_elem = (jnp.dtype(y_pred.dtype).itemsize
                      + jnp.dtype(y_true.dtype).itemsize)
    cost = pl.CostEstimate(
        flops=3 * bulk,
        transcendentals=0,
        bytes_accessed=bulk * bytes_per_elem + out_rows * _LANES * 4,
    )

    partials = pl.pallas_call(
        kernel,
        out_shape=jax.ShapeDtypeStruct((out_rows, _LANES), jnp.float32),
        grid_spec=pltpu.PrefetchScalarGridSpec(
            num_scalar_prefetch=0,
            grid=(num_splits, steps_per_split),
            in_specs=[
                pl.BlockSpec((block_rows, _LANES), in_map),
                pl.BlockSpec((block_rows, _LANES), in_map),
            ],
            out_specs=pl.BlockSpec((acc_rows, _LANES), lambda c, i: (c, 0)),
        ),
        compiler_params=pltpu.CompilerParams(
            dimension_semantics=("parallel", "arbitrary"),
            vmem_limit_bytes=_VMEM_LIMIT_BYTES,
        ),
        cost_estimate=cost,
    )(yt2d, yp2d)

    # Tiny final cross-lane reduction (<= 2*32*128 elements) done by XLA.
    return (jnp.sum(partials) + tail_sum) / jnp.float32(total_count)


def _ref_loss(y_pred, y_true, negative_slope=0.05):
    diff = y_true.astype(jnp.float32) - y_pred.astype(jnp.float32)
    lrelu = jnp.where(diff >= 0, diff, diff * negative_slope)
    return jnp.mean(jnp.abs(lrelu))


if __name__ == "__main__":
    key = jax.random.PRNGKey(0)
    k1, k2, k3, k4, k5, k6 = jax.random.split(key, 6)

    # Main case: NCHW like the PyTorch module's typical inputs
    # (2048 elements, a multiple of 128 -> zero-copy single-block path).
    shape = (2, 4, 16, 16)
    y_pred = jax.random.normal(k1, shape, dtype=jnp.float32)
    y_true = jax.random.normal(k2, shape, dtype=jnp.float32)
    loss = jax.block_until_ready(custom_loss(y_pred, y_true))
    ref = _ref_loss(y_pred, y_true)
    assert jnp.allclose(loss, ref, rtol=1e-5, atol=1e-6), (loss, ref)

    # Multi-step path with a trailing partial (masked) block: 2560 elements
    # -> 20 rows, 16-row blocks, 2 reduction steps.
    shape2 = (4, 5, 128)
    y_pred2 = jax.random.normal(k3, shape2, dtype=jnp.float32)
    y_true2 = jax.random.normal(k4, shape2, dtype=jnp.float32)
    loss2 = jax.block_until_ready(custom_loss(y_pred2, y_true2))
    ref2 = _ref_loss(y_pred2, y_true2)
    assert jnp.allclose(loss2, ref2, rtol=1e-5, atol=1e-6), (loss2, ref2)

    # Ragged-tail path (total % 128 != 0).
    shape3 = (2, 531)
    y_pred3 = jax.random.normal(k5, shape3, dtype=jnp.float32)
    y_true3 = jax.random.normal(k6, shape3, dtype=jnp.float32)
    loss3 = jax.block_until_ready(custom_loss(y_pred3, y_true3))
    ref3 = _ref_loss(y_pred3, y_true3)
    assert jnp.allclose(loss3, ref3, rtol=1e-5, atol=1e-6), (loss3, ref3)

    print("KERNEL_OK")
</pallas_src>

<mosaic_0001>
module attributes {stable_mosaic.version = 11 : i64} {
  func.func @_loss_sum_kernel(%arg0: i32, %arg1: i32, %arg2: memref<16x128xf32, #tpu.memory_space<vmem>>, %arg3: memref<16x128xf32, #tpu.memory_space<vmem>>, %arg4: memref<16x128xf32, #tpu.memory_space<vmem>>) attributes {dimension_semantics = [#tpu.dimension_semantics<parallel>, #tpu.dimension_semantics<arbitrary>], iteration_bounds = array<i64: 1, 1>, scalar_prefetch = 0 : i64, scratch_operands = 0 : i64, tpu.core_type = #tpu.core_type<tc>, window_params = [{transform_indices = @transform_0, window_bounds = array<i64: 16, 128>}, {transform_indices = @transform_1, window_bounds = array<i64: 16, 128>}, {transform_indices = @transform_2, window_bounds = array<i64: 16, 128>}]} {
    %c0_i32 = arith.constant 0 : i32
    %0 = arith.cmpi eq, %arg1, %c0_i32 : i32
    %1 = arith.extui %0 : i1 to i32
    %c0_i32_0 = arith.constant 0 : i32
    %2 = arith.cmpi ne, %1, %c0_i32_0 : i32
    scf.if %2 {
      %cst_9 = arith.constant 0.000000e+00 : f32
      %21 = vector.broadcast %cst_9 : f32 to vector<16x128xf32>
      %c0_10 = arith.constant 0 : index
      %c0_11 = arith.constant 0 : index
      %22 = vector.load %arg4[%c0_10, %c0_11] : memref<16x128xf32, #tpu.memory_space<vmem>>, vector<16x128xf32>
      tpu.vector_store %arg4[%c0_10, %c0_11], %21 {strides = array<i32>} : memref<16x128xf32, #tpu.memory_space<vmem>>, vector<16x128xf32>,
    } else {
    }
    %c0 = arith.constant 0 : index
    %c0_1 = arith.constant 0 : index
    %3 = vector.load %arg2[%c0, %c0_1] : memref<16x128xf32, #tpu.memory_space<vmem>>, vector<16x128xf32>
    %c0_2 = arith.constant 0 : index
    %c0_3 = arith.constant 0 : index
    %4 = vector.load %arg3[%c0_2, %c0_3] : memref<16x128xf32, #tpu.memory_space<vmem>>, vector<16x128xf32>
    %5 = arith.subf %3, %4 : vector<16x128xf32>
    %cst = arith.constant 0.000000e+00 : f32
    %6 = vector.broadcast %cst : f32 to vector<16x128xf32>
    %7 = arith.cmpf oge, %5, %6 : vector<16x128xf32>
    %cst_4 = arith.constant -5.000000e-02 : f32
    %8 = vector.broadcast %cst_4 : f32 to vector<16x128xf32>
    %9 = arith.mulf %5, %8 : vector<16x128xf32>
    %10 = arith.select %7, %5, %9 : vector<16x128xi1>, vector<16x128xf32>
    %c1_i32 = arith.constant 1 : i32
    %11 = arith.muli %arg0, %c1_i32 : i32
    %12 = arith.addi %11, %arg1 : i32
    %c16_i32 = arith.constant 16 : i32
    %13 = arith.muli %12, %c16_i32 : i32
    %c16_i32_5 = arith.constant 16 : i32
    %14 = arith.addi %13, %c16_i32_5 : i32
    %c16_i32_6 = arith.constant 16 : i32
    %15 = arith.cmpi sgt, %14, %c16_i32_6 : i32
    %true = arith.constant true
    %16 = arith.xori %15, %true : i1
    %17 = arith.extui %16 : i1 to i32
    %c0_i32_7 = arith.constant 0 : i32
    %18 = arith.cmpi ne, %17, %c0_i32_7 : i32
    scf.if %18 {
      %c0_9 = arith.constant 0 : index
      %c0_10 = arith.constant 0 : index
      %21 = vector.load %arg4[%c0_9, %c0_10] : memref<16x128xf32, #tpu.memory_space<vmem>>, vector<16x128xf32>
      %22 = vector.shape_cast %10 : vector<16x128xf32> to vector<1x16x128xf32>
      %cst_11 = arith.constant dense<0.000000e+00> : vector<16x128xf32>
      %23 = vector.multi_reduction <add>, %22, %cst_11 [0] : vector<1x16x128xf32> to vector<16x128xf32>
      %24 = arith.addf %21, %23 : vector<16x128xf32>
      %c0_12 = arith.constant 0 : index
      %c0_13 = arith.constant 0 : index
      %25 = vector.load %arg4[%c0_12, %c0_13] : memref<16x128xf32, #tpu.memory_space<vmem>>, vector<16x128xf32>
      tpu.vector_store %arg4[%c0_12, %c0_13], %24 {strides = array<i32>} : memref<16x128xf32, #tpu.memory_space<vmem>>, vector<16x128xf32>,
    } else {
    }
    %19 = arith.extui %15 : i1 to i32
    %c0_i32_8 = arith.constant 0 : i32
    %20 = arith.cmpi ne, %19, %c0_i32_8 : i32
    scf.if %20 {
      %21 = tpu.iota {dimensions = array<i32: 0>} : vector<16x128xi32>
      %22 = vector.broadcast %13 : i32 to vector<16x128xi32>
      %23 = arith.addi %21, %22 : vector<16x128xi32>
      %c16_i32_9 = arith.constant 16 : i32
      %24 = vector.broadcast %c16_i32_9 : i32 to vector<16x128xi32>
      %25 = arith.cmpi slt, %23, %24 : vector<16x128xi32>
      %cst_10 = arith.constant 0.000000e+00 : f32
      %26 = vector.broadcast %cst_10 : f32 to vector<16x128xf32>
      %27 = arith.select %25, %10, %26 : vector<16x128xi1>, vector<16x128xf32>
      %c0_11 = arith.constant 0 : index
      %c0_12 = arith.constant 0 : index
      %28 = vector.load %arg4[%c0_11, %c0_12] : memref<16x128xf32, #tpu.memory_space<vmem>>, vector<16x128xf32>
      %29 = vector.shape_cast %27 : vector<16x128xf32> to vector<1x16x128xf32>
      %cst_13 = arith.constant dense<0.000000e+00> : vector<16x128xf32>
      %30 = vector.multi_reduction <add>, %29, %cst_13 [0] : vector<1x16x128xf32> to vector<16x128xf32>
      %31 = arith.addf %28, %30 : vector<16x128xf32>
      %c0_14 = arith.constant 0 : index
      %c0_15 = arith.constant 0 : index
      %32 = vector.load %arg4[%c0_14, %c0_15] : memref<16x128xf32, #tpu.memory_space<vmem>>, vector<16x128xf32>
      tpu.vector_store %arg4[%c0_14, %c0_15], %31 {strides = array<i32>} : memref<16x128xf32, #tpu.memory_space<vmem>>, vector<16x128xf32>,
    } else {
    }
    return
  }
  func.func @transform_0(%arg0: i32, %arg1: i32) -> (i32, i32) {
    %c1_i32 = arith.constant 1 : i32
    %0 = arith.muli %arg0, %c1_i32 : i32
    %1 = arith.addi %0, %arg1 : i32
    %c0_i32 = arith.constant 0 : i32
    %2 = arith.minsi %1, %c0_i32 : i32
    %c0_i32_0 = arith.constant 0 : i32
    %c0_i32_1 = arith.constant 0 : i32
    return %2, %c0_i32_0 : i32, i32
  }
  func.func @transform_1(%arg0: i32, %arg1: i32) -> (i32, i32) {
    %c1_i32 = arith.constant 1 : i32
    %0 = arith.muli %arg0, %c1_i32 : i32
    %1 = arith.addi %0, %arg1 : i32
    %c0_i32 = arith.constant 0 : i32
    %2 = arith.minsi %1, %c0_i32 : i32
    %c0_i32_0 = arith.constant 0 : i32
    %c0_i32_1 = arith.constant 0 : i32
    return %2, %c0_i32_0 : i32, i32
  }
  func.func @transform_2(%arg0: i32, %arg1: i32) -> (i32, i32) {
    %c0_i32 = arith.constant 0 : i32
    %c0_i32_0 = arith.constant 0 : i32
    return %arg0, %c0_i32 : i32, i32
  }
}

</mosaic_0001>

<bundles_post_ra>
// kernel: tpu_custom_call.1
= control target key start
LH: loop header
LB: loop body
LE: loop exit
PB: predicated region body
PF: predicated region fallthrough
CT: control target
= control target key end

     0   :  { %7 = vsyncpa [#allocation3], 0  ;;  %s265_s0 = inlined_call_operand.hbm [shape: f32[16,128], index: 0, kind: input, shape index: {}]   ;;  %s266_s1 = inlined_call_operand.hbm [shape: f32[16,128], index: 1, kind: input, shape index: {}]   ;;  %s267_s2 = inlined_call_operand.hbm [shape: f32[16,128], index: 2, kind: output, shape index: {}]  }
   0x1   :  { %8 = vsyncpa [#allocation6], 0 }
   0x2   :  { %9 = vsyncpa [#allocation4], 0  ;;  %s20_s11 = sshll.u32 %s265_s0, 4  ;;  %s227_s12 = smov [#allocation2]   ;;  %s21_s11 = int_to_ptr.hbm [resolvable:$true] %s20_s11 }
   0x3   :  { %s22_s13 = sshll.u32 %s227_s12, 4  ;;  %s39_s16 = sshll.u32 %s266_s1, 4  ;;  %s23_s13 = int_to_ptr.vmem [resolvable:$true] %s22_s13  ;;  %s40_s16 = int_to_ptr.hbm [resolvable:$true] %s39_s16 }
   0x4   :  { %s228_s17 = smov 128   ;;  %s229_s18 = smov 8  }
   0x5   :  { %28 = dma.hbm_to_vmem [thread:$0]  %s21_s11, 256, %s23_s13, [#allocation3], %s228_s17, %s228_s17, %s229_s18  }
   0x6   :  { %s230_s19 = smov [#allocation5]  }
   0x7   :  { %s41_s20 = sshll.u32 %s230_s19, 4  ;;  %s42_s20 = int_to_ptr.vmem [resolvable:$true] %s41_s20 }
   0x8   :  { %47 = dma.hbm_to_vmem [thread:$0]  %s40_s16, 256, %s42_s20, [#allocation6], %s228_s17, %s228_s17, %s229_s18  }
   0x9   :  { %221 = dma.done.wait [#allocation3], 256  }
   0xa   :  { %222 = vsyncadd [#allocation3], 4294967040 }
   0xb   :  { %223 = dma.done.wait [#allocation6], 256  }
   0xc   :  { %224 = vsyncadd [#allocation6], 4294967040  ;;  %v70_v0 = vld [vmem:[#allocation2] sm:$0xff]  ;;  %v72_v1 = vld [vmem:[#allocation5] sm:$0xff]  ;;  %s231_s0 = smov [#allocation7]   ;;  %s125_s23 = sshll.u32 %s267_s2, 4  ;;  %s126_s23 = int_to_ptr.hbm [resolvable:$true] %s125_s23 }
   0xd   :  { %v71_v2 = vld [vmem:[#allocation2 + $0x8] sm:$0xff]  ;;  %v74_v3 = vsub.f32 %v70_v0, %v72_v1  ;;  %v73_v4 = vld [vmem:[#allocation5 + $0x8] sm:$0xff]  ;;  %s123_s1 = sshll.u32 %s231_s0, 4  ;;  %s124_s1 = int_to_ptr.vmem [resolvable:$true] %s123_s1 }
   0xe   :  { %v75_v5 = vsub.f32 %v71_v2, %v73_v4 }
   0xf   :  { %vm76_vm0 = vcmp.ge.f32.partialorder %v74_v3, 0.0  ;;  %v78_v6 = vmul.f32 -0.05, %v74_v3 }
  0x10   :  { %vm77_vm1 = vcmp.ge.f32.partialorder %v75_v5, 0.0  ;;  %v79_v7 = vmul.f32 -0.05, %v75_v5 }
  0x11   :  { %v80_v8 = vsel %vm76_vm0, %v74_v3, %v78_v6 }
  0x12   :  { %v81_v9 = vsel %vm77_vm1, %v75_v5, %v79_v7  ;;  %96 = vst [vmem:[#allocation7] sm:$0xff] %v80_v8 }
  0x13   :  { %97 = vst [vmem:[#allocation7 + $0x8] sm:$0xff] %v81_v9 }
  0x14   :  { %131 = dma.vmem_to_hbm [thread:$0]  %s124_s1, 256, %s126_s23, [#allocation4], %s228_s17, %s228_s17, %s229_s18  }
  0x15   :  { %225 = dma.done.wait [#allocation4], 256  }
  0x16   :  { %226 = vsyncadd [#allocation4], 4294967040 }
  0x17   :  { %136 = vsyncpa [#allocation3], 1 }
  0x18   :  { %137 = vsyncpa [#allocation6], 1 }
  0x19   :  { %138 = vsyncpa [#allocation4], 1 }

</bundles_post_ra>
